<compile_context>
chip_gen: v7x
topology: tpu7x:2x2x1
jax: 0.10.0
libtpu: 0.0.40
codegen_flags: <defaults>
</compile_context>

<pallas_src>
import jax
import jax.numpy as jnp
from jax.experimental import pallas as pl
from jax.experimental.pallas import tpu as pltpu


def _round_up(n, m):
    return ((n + m - 1) // m) * m


def policy_kernel(x_ref, w1t_ref, b1_ref, w2t_ref, b2_ref,
                  action_ref, logp_ref, ent_ref):
    x = x_ref[...]                                              # (TM, D) f32

    # Hidden pre-activation directly in lane-major (H, TM) layout:
    #   a1t[h, m] = sum_d W1[h, d] * x[m, d]      (trans-B matmul, q @ k.T pattern)
    a1t = jax.lax.dot_general(
        w1t_ref[...], x,
        dimension_numbers=(((1,), (1,)), ((), ())),
        preferred_element_type=jnp.float32,
    )                                                           # (H, TM)
    ht = jnp.tanh(a1t + b1_ref[...])                            # (H, TM), dense EUP

    # Action logits, also lane-major: (A, TM)
    logits_t = (
        jnp.dot(w2t_ref[...], ht, preferred_element_type=jnp.float32)
        + b2_ref[...]
    )                                                           # (A, TM)

    A, TM = logits_t.shape

    # Numerically-stable softmax statistics, reduced over the tiny sublane axis.
    m = jnp.max(logits_t, axis=0, keepdims=True)                # (1, TM)
    z = logits_t - m                                            # (A, TM)
    ez = jnp.exp(z)
    ssum = jnp.sum(ez, axis=0, keepdims=True)                   # (1, TM)
    log_ssum = jnp.log(ssum)                                    # (1, TM)

    # log_prob(argmax): z[argmax] == 0  =>  log_softmax[argmax] = -log(ssum)
    logp = -log_ssum                                            # (1, TM)

    # entropy = -sum(p * log p) = log(ssum) - sum(ez * z) / ssum
    ent = log_ssum - jnp.sum(ez * z, axis=0, keepdims=True) / ssum   # (1, TM)

    # argmax over the action (sublane) axis, first maximal index.
    row = jax.lax.broadcasted_iota(jnp.int32, (A, TM), dimension=0)
    action = jnp.min(jnp.where(logits_t == m, row, A), axis=0, keepdims=True)

    # Lane-dense (1, TM) stores.
    action_ref[...] = action.astype(jnp.int32)
    logp_ref[...] = logp
    ent_ref[...] = ent


def categorical_policy_net(x, w1t, b1, w2t, b2, *, tm=4096):
    """x: (B, obs_dim) f32.
    Params in PyTorch layout: w1t (16, obs_dim), b1 (16, 1),
    w2t (action_dim, 16), b2 (action_dim, 1).
    Returns (action (B,) int32, log_prob (B,) f32, entropy (B,) f32)."""
    B, D = x.shape
    H = w1t.shape[0]
    A = w2t.shape[0]

    # Batch tile: big (per-grid-step overhead dominates otherwise), never much
    # larger than the batch, and with >= 2 grid steps when the batch allows so
    # both v7x TensorCores get work under the "parallel" annotation.
    tm = min(tm, _round_up(max(B, 1), 8))
    if B >= 256:
        tm = min(tm, _round_up(pl.cdiv(B, 2), 128))
    tm = max(tm, 8)

    grid_len = pl.cdiv(B, tm)

    action, logp, ent = pl.pallas_call(
        policy_kernel,
        out_shape=(
            jax.ShapeDtypeStruct((grid_len, tm), jnp.int32),
            jax.ShapeDtypeStruct((grid_len, tm), jnp.float32),
            jax.ShapeDtypeStruct((grid_len, tm), jnp.float32),
        ),
        grid_spec=pltpu.PrefetchScalarGridSpec(
            num_scalar_prefetch=0,
            grid=(grid_len,),
            in_specs=[
                pl.BlockSpec((tm, D), lambda i: (i, 0)),   # x: streamed per tile (f32)
                pl.BlockSpec((H, D), lambda i: (0, 0)),    # W1 (out,in): VMEM-resident
                pl.BlockSpec((H, 1), lambda i: (0, 0)),    # b1 column
                pl.BlockSpec((A, H), lambda i: (0, 0)),    # W2 (out,in): VMEM-resident
                pl.BlockSpec((A, 1), lambda i: (0, 0)),    # b2 column
            ],
            out_specs=[
                pl.BlockSpec((1, tm), lambda i: (i, 0)),   # lane-dense outputs
                pl.BlockSpec((1, tm), lambda i: (i, 0)),
                pl.BlockSpec((1, tm), lambda i: (i, 0)),
            ],
        ),
        compiler_params=pltpu.CompilerParams(
            dimension_semantics=("parallel",),             # batch axis across TCs (v7x)
            vmem_limit_bytes=32 * 1024 * 1024,             # safe on every generation
        ),
    )(x, w1t, b1, w2t, b2)

    return (action.reshape(-1)[:B],
            logp.reshape(-1)[:B],
            ent.reshape(-1)[:B])


def init_params(key, obs_dim, action_dim, hidden=16):
    """Deterministic synthetic parameters, PyTorch Linear layout (out, in)."""
    k1, k2, k3, k4 = jax.random.split(key, 4)
    bound1 = 1.0 / (obs_dim ** 0.5)
    bound2 = 1.0 / (hidden ** 0.5)
    w1t = jax.random.uniform(k1, (hidden, obs_dim), jnp.float32, -bound1, bound1)
    b1 = jax.random.uniform(k2, (hidden, 1), jnp.float32, -bound1, bound1)
    w2t = jax.random.uniform(k3, (action_dim, hidden), jnp.float32, -bound2, bound2)
    b2 = jax.random.uniform(k4, (action_dim, 1), jnp.float32, -bound2, bound2)
    return w1t, b1, w2t, b2


if __name__ == "__main__":
    B, OBS_DIM, ACTION_DIM = 8, 32, 6

    key = jax.random.PRNGKey(0)
    kx, kp = jax.random.split(key)
    x = jax.random.normal(kx, (B, OBS_DIM), dtype=jnp.float32)
    w1t, b1, w2t, b2 = init_params(kp, OBS_DIM, ACTION_DIM)

    action, log_prob, entropy = categorical_policy_net(x, w1t, b1, w2t, b2)
    jax.block_until_ready((action, log_prob, entropy))

    # Plain-JAX f32 reference matching the PyTorch module exactly.
    h_ref = jnp.tanh(x @ w1t.T + b1[:, 0])
    logits_ref = h_ref @ w2t.T + b2[:, 0]
    logsoft_ref = jax.nn.log_softmax(logits_ref, axis=-1)
    action_ref = jnp.argmax(logits_ref, axis=-1)
    logp_ref = jnp.take_along_axis(logsoft_ref, action_ref[:, None], axis=-1)[:, 0]
    ent_ref = -jnp.sum(jnp.exp(logsoft_ref) * logsoft_ref, axis=-1)

    assert jnp.all(action == action_ref.astype(jnp.int32))
    assert jnp.allclose(log_prob, logp_ref, atol=1e-4)
    assert jnp.allclose(entropy, ent_ref, atol=1e-4)

    print("KERNEL_OK")
</pallas_src>

<mosaic_0001>
module attributes {stable_mosaic.version = 11 : i64} {
  func.func @policy_kernel(%arg0: i32, %arg1: memref<8x32xf32, #tpu.memory_space<vmem>>, %arg2: memref<16x32xf32, #tpu.memory_space<vmem>>, %arg3: memref<16x1xf32, #tpu.memory_space<vmem>>, %arg4: memref<6x16xf32, #tpu.memory_space<vmem>>, %arg5: memref<6x1xf32, #tpu.memory_space<vmem>>, %arg6: memref<1x8xi32, #tpu.memory_space<vmem>>, %arg7: memref<1x8xf32, #tpu.memory_space<vmem>>, %arg8: memref<1x8xf32, #tpu.memory_space<vmem>>) attributes {dimension_semantics = [#tpu.dimension_semantics<parallel>], iteration_bounds = array<i64: 1>, scalar_prefetch = 0 : i64, scratch_operands = 0 : i64, tpu.core_type = #tpu.core_type<tc>, window_params = [{transform_indices = @transform_0, window_bounds = array<i64: 8, 32>}, {pipeline_mode = #tpu.pipeline_mode<synchronous>, transform_indices = @transform_1, window_bounds = array<i64: 16, 32>}, {pipeline_mode = #tpu.pipeline_mode<synchronous>, transform_indices = @transform_2, window_bounds = array<i64: 16, 1>}, {pipeline_mode = #tpu.pipeline_mode<synchronous>, transform_indices = @transform_3, window_bounds = array<i64: 6, 16>}, {pipeline_mode = #tpu.pipeline_mode<synchronous>, transform_indices = @transform_4, window_bounds = array<i64: 6, 1>}, {transform_indices = @transform_5, window_bounds = array<i64: 1, 8>}, {transform_indices = @transform_6, window_bounds = array<i64: 1, 8>}, {transform_indices = @transform_7, window_bounds = array<i64: 1, 8>}]} {
    %c0 = arith.constant 0 : index
    %c0_0 = arith.constant 0 : index
    %0 = vector.load %arg1[%c0, %c0_0] : memref<8x32xf32, #tpu.memory_space<vmem>>, vector<8x32xf32>
    %c0_1 = arith.constant 0 : index
    %c0_2 = arith.constant 0 : index
    %1 = vector.load %arg2[%c0_1, %c0_2] : memref<16x32xf32, #tpu.memory_space<vmem>>, vector<16x32xf32>
    %cst = arith.constant dense<0.000000e+00> : vector<16x8xf32>
    %2 = tpu.matmul %1, %0, %cst {dimension_numbers = #tpu.dot_dimension_numbers<[1], [1], [0], [0], [0, 0, 1, 0], [], []>} : vector<16x32xf32>, vector<8x32xf32>, vector<16x8xf32> -> vector<16x8xf32>
    %c0_3 = arith.constant 0 : index
    %c0_4 = arith.constant 0 : index
    %3 = vector.load %arg3[%c0_3, %c0_4] : memref<16x1xf32, #tpu.memory_space<vmem>>, vector<16x1xf32>
    %4 = vector.broadcast %3 : vector<16x1xf32> to vector<16x8xf32>
    %5 = arith.addf %2, %4 : vector<16x8xf32>
    %6 = math.tanh %5 : vector<16x8xf32>
    %c0_5 = arith.constant 0 : index
    %c0_6 = arith.constant 0 : index
    %7 = vector.load %arg4[%c0_5, %c0_6] : memref<6x16xf32, #tpu.memory_space<vmem>>, vector<6x16xf32>
    %cst_7 = arith.constant dense<0.000000e+00> : vector<6x8xf32>
    %8 = tpu.matmul %7, %6, %cst_7 {dimension_numbers = #tpu.dot_dimension_numbers<[1], [0], [0], [1], [0, 0, 1, 1], [], []>} : vector<6x16xf32>, vector<16x8xf32>, vector<6x8xf32> -> vector<6x8xf32>
    %c0_8 = arith.constant 0 : index
    %c0_9 = arith.constant 0 : index
    %9 = vector.load %arg5[%c0_8, %c0_9] : memref<6x1xf32, #tpu.memory_space<vmem>>, vector<6x1xf32>
    %10 = vector.broadcast %9 : vector<6x1xf32> to vector<6x8xf32>
    %11 = arith.addf %8, %10 : vector<6x8xf32>
    %cst_10 = arith.constant dense<0xFF800000> : vector<8xf32>
    %12 = vector.multi_reduction <maximumf>, %11, %cst_10 [0] : vector<6x8xf32> to vector<8xf32>
    %13 = vector.shape_cast %12 : vector<8xf32> to vector<1x8xf32>
    %14 = vector.broadcast %13 : vector<1x8xf32> to vector<6x8xf32>
    %15 = arith.subf %11, %14 : vector<6x8xf32>
    %16 = math.exp %15 : vector<6x8xf32>
    %cst_11 = arith.constant dense<0.000000e+00> : vector<8xf32>
    %17 = vector.multi_reduction <add>, %16, %cst_11 [0] : vector<6x8xf32> to vector<8xf32>
    %18 = vector.shape_cast %17 : vector<8xf32> to vector<1x8xf32>
    %19 = math.log %18 : vector<1x8xf32>
    %cst_12 = arith.constant 0.000000e+00 : f32
    %20 = vector.broadcast %cst_12 : f32 to vector<1x8xf32>
    %21 = arith.subf %20, %19 : vector<1x8xf32>
    %22 = arith.mulf %16, %15 : vector<6x8xf32>
    %cst_13 = arith.constant dense<0.000000e+00> : vector<8xf32>
    %23 = vector.multi_reduction <add>, %22, %cst_13 [0] : vector<6x8xf32> to vector<8xf32>
    %24 = vector.shape_cast %23 : vector<8xf32> to vector<1x8xf32>
    %25 = arith.divf %24, %18 : vector<1x8xf32>
    %26 = arith.subf %19, %25 : vector<1x8xf32>
    %27 = tpu.iota {dimensions = array<i32: 0>} : vector<6x8xi32>
    %28 = vector.broadcast %13 : vector<1x8xf32> to vector<6x8xf32>
    %29 = arith.cmpf oeq, %11, %28 : vector<6x8xf32>
    %c6_i32 = arith.constant 6 : i32
    %30 = vector.broadcast %c6_i32 : i32 to vector<6x8xi32>
    %31 = arith.select %29, %27, %30 : vector<6x8xi1>, vector<6x8xi32>
    %cst_14 = arith.constant dense<2147483647> : vector<8xi32>
    %32 = vector.multi_reduction <minsi>, %31, %cst_14 [0] : vector<6x8xi32> to vector<8xi32>
    %33 = vector.shape_cast %32 : vector<8xi32> to vector<1x8xi32>
    %c0_15 = arith.constant 0 : index
    %c0_16 = arith.constant 0 : index
    %34 = vector.load %arg6[%c0_15, %c0_16] : memref<1x8xi32, #tpu.memory_space<vmem>>, vector<1x8xi32>
    tpu.vector_store %arg6[%c0_15, %c0_16], %33 {strides = array<i32>} : memref<1x8xi32, #tpu.memory_space<vmem>>, vector<1x8xi32>,
    %c0_17 = arith.constant 0 : index
    %c0_18 = arith.constant 0 : index
    %35 = vector.load %arg7[%c0_17, %c0_18] : memref<1x8xf32, #tpu.memory_space<vmem>>, vector<1x8xf32>
    tpu.vector_store %arg7[%c0_17, %c0_18], %21 {strides = array<i32>} : memref<1x8xf32, #tpu.memory_space<vmem>>, vector<1x8xf32>,
    %c0_19 = arith.constant 0 : index
    %c0_20 = arith.constant 0 : index
    %36 = vector.load %arg8[%c0_19, %c0_20] : memref<1x8xf32, #tpu.memory_space<vmem>>, vector<1x8xf32>
    tpu.vector_store %arg8[%c0_19, %c0_20], %26 {strides = array<i32>} : memref<1x8xf32, #tpu.memory_space<vmem>>, vector<1x8xf32>,
    return
  }
  func.func @transform_0(%arg0: i32) -> (i32, i32) {
    %c0_i32 = arith.constant 0 : i32
    %c0_i32_0 = arith.constant 0 : i32
    return %arg0, %c0_i32 : i32, i32
  }
  func.func @transform_1(%arg0: i32) -> (i32, i32) {
    %c0_i32 = arith.constant 0 : i32
    %c0_i32_0 = arith.constant 0 : i32
    %c0_i32_1 = arith.constant 0 : i32
    return %c0_i32, %c0_i32_0 : i32, i32
  }
  func.func @transform_2(%arg0: i32) -> (i32, i32) {
    %c0_i32 = arith.constant 0 : i32
    %c0_i32_0 = arith.constant 0 : i32
    %c0_i32_1 = arith.constant 0 : i32
    return %c0_i32, %c0_i32_0 : i32, i32
  }
  func.func @transform_3(%arg0: i32) -> (i32, i32) {
    %c0_i32 = arith.constant 0 : i32
    %c0_i32_0 = arith.constant 0 : i32
    %c0_i32_1 = arith.constant 0 : i32
    return %c0_i32, %c0_i32_0 : i32, i32
  }
  func.func @transform_4(%arg0: i32) -> (i32, i32) {
    %c0_i32 = arith.constant 0 : i32
    %c0_i32_0 = arith.constant 0 : i32
    %c0_i32_1 = arith.constant 0 : i32
    return %c0_i32, %c0_i32_0 : i32, i32
  }
  func.func @transform_5(%arg0: i32) -> (i32, i32) {
    %c0_i32 = arith.constant 0 : i32
    %c0_i32_0 = arith.constant 0 : i32
    return %arg0, %c0_i32 : i32, i32
  }
  func.func @transform_6(%arg0: i32) -> (i32, i32) {
    %c0_i32 = arith.constant 0 : i32
    %c0_i32_0 = arith.constant 0 : i32
    return %arg0, %c0_i32 : i32, i32
  }
  func.func @transform_7(%arg0: i32) -> (i32, i32) {
    %c0_i32 = arith.constant 0 : i32
    %c0_i32_0 = arith.constant 0 : i32
    return %arg0, %c0_i32 : i32, i32
  }
}

</mosaic_0001>

<bundles_post_ra>
// kernel: tpu_custom_call.1
= control target key start
LH: loop header
LB: loop body
LE: loop exit
PB: predicated region body
PF: predicated region fallthrough
CT: control target
= control target key end

     0   :  { %13 = vsyncpa [#allocation3], 0  ;;  %vm40_vm0 = vcmask 261120   ;;  %s532_s0 = inlined_call_operand.vmem [shape: f32[8,32], index: 0, kind: input, shape index: {}]   ;;  %s533_s1 = inlined_call_operand.vmem [shape: f32[16,32], index: 1, kind: input, shape index: {}]   ;;  %s534_s2 = inlined_call_operand.vmem [shape: f32[16,1], index: 2, kind: input, shape index: {}]   ;;  %s535_s3 = inlined_call_operand.vmem [shape: f32[6,16], index: 3, kind: input, shape index: {}]   ;;  %s536_s4 = inlined_call_operand.vmem [shape: f32[6,1], index: 4, kind: input, shape index: {}]   ;;  %s537_s5 = inlined_call_operand.hbm [shape: s32[1,8], index: 5, kind: output, shape index: {0}]   ;;  %s538_s6 = inlined_call_operand.hbm [shape: f32[1,8], index: 6, kind: output, shape index: {1}]   ;;  %s539_s7 = inlined_call_operand.hbm [shape: f32[1,8], index: 7, kind: output, shape index: {2}]  }
   0x1   :  { %v25_v0 = vld [vmem:[%s532_s0] sm:$0xff] }
   0x2   :  { %v26_v1 = vld [vmem:[%s533_s1] sm:$0xff]  ;;  %309 = vmatprep.subr.msk.mxu0 %vm40_vm0, %v25_v0 }
   0x3   :  { %311 = vmatprep.mubr.msk.f32.mxu0 %vm40_vm0, %v26_v1  ;;  %v28_v2 = vld [vmem:[%s534_s2] sm:$0xff] }
   0x4   :  { %14 = vsyncpa [#allocation5], 0  ;;  %310 = vmatpush3.xpose.msk.msra.mxu0 %vm40_vm0, %v25_v0  ;;  %v27_v3 = vld [vmem:[%s533_s1 + $0x8] sm:$0xff]  ;;  %v413_v4 = vmov 0   ;;  %v414_v6 = vmov 0.0|0.0   ;;  %vm415_vm1 = vmmov 0   ;;  %v240_v27 = vlaneseq }
   0x5   :  { %331 = vset.pattern.permute.xlu0 %v413_v4  ;;  %332 = vset.pattern.permute.xlu1 %v413_v4  ;;  %v29_v5 = vld [vmem:[%s534_s2 + $0x8] sm:$0xff]  ;;  %v416_v7 = vmov 0.0   ;;  %v128_v8 = vld [vmem:[%s536_s4] sm:$0x3f]  ;;  %vm134_vm2 = vcmask 130048   ;;  %vm208_vm3 = vcmask 62464  }
   0x6   :  { %32 = vperm.xlu0 %331, %v28_v2   ;;  %321 = vmatprep.subr.bf16.mxu1 %v414_v6  ;;  %v127_v18 = vld [vmem:[%s535_s3] sm:$0x3f]  ;;  %v241_v30 = vshrl.u32 %v240_v27, 7  ;;  %s417_s3 = smov [#allocation2]   ;;  %vm254_vm7 = vcmask 57344  }
   0x7   :  { %312 = vmatmul.mubr.msk.f32.vlgmr.msra.gmra.mrb[0].mxu0 %vm40_vm0, %v27_v3  ;;  %318 = vmatprep.mubr.msk.f32.mxu1 %vm415_vm1, %v416_v7  ;;  %s264_s4 = sshll.u32 %s417_s3, 4  ;;  %s265_s4 = int_to_ptr.vmem [resolvable:$true] %s264_s4 }
   0x8   :  { %131 = vperm.xlu1 %332, %v128_v8   ;;  %s343_s12 = scalar_lea.vmem %s265_s4, 16  ;;  %s347_s13 = scalar_lea.vmem %s265_s4, 32 }
   0x9   :  { %p344_p0 = scmp.ne.s32.totalorder %s265_s4, %s343_s12  ;;  %p348_p1 = scmp.lt.s32.totalorder %s265_s4, %s265_s4 }
   0xa   :  { %37 = vperm.xlu0 %331, %v29_v5   ;;  %p349_p2 = scmp.lt.s32.totalorder %s347_s13, %s343_s12 }
   0xc   :  { %p350_p3 = por %p349_p2, %p348_p1 }
   0xe   :  { %p351_p4 = pnand %p350_p3, %p344_p0 }
  0x85   :  { %v33_v9 = vpop.permute.xlu0 %32 }
  0x87   :  { %v132_v19 = vpop.permute.xlu1 %131 }
  0x89   :  { %v38_v10 = vpop.permute.xlu0 %37 }
  0xda   :  { %v313_v11 = vpop.f32.mrb[0].mxu0 }
  0xdb   :  { %v122_v12 = vadd.f32 %v313_v11, %v38_v10  ;;  %v116_v13 = vpop.f32.mrb[1].mxu0 }
  0xdc   :  { %v117_v14 = vadd.f32 %v116_v13, %v33_v9 }
  0xdd   :  { %333 = vtanh.f32 %v122_v12 }
  0xde   :  { %335 = vtanh.f32 %v117_v14 }
  0xe7   :  { %v334_v15 = vpop.eup %333 }
  0xe8   :  { %v336_v16 = vpop.eup %335 }
  0xe9   :  { %v322_v17 = vpack.c.bf16 %v334_v15, %v336_v16 }
  0xeb   :  { %323 = vmatpush3.bf16.msra.mxu1 %v322_v17 }
  0xee   :  { %319 = vmatmul.mubr.msk.f32.vlgmr.msra.gmra.mrb[0].mxu1 %vm134_vm2, %v127_v18 }
 0x1c1   :  { %v204_v20 = vpop.f32.mrb[0].mxu1 }
 0x1c2   :  { %v205_v21 = vadd.f32 %v204_v20, %v132_v19  ;;  %v320_v22 = vpop.f32.mrb[1].mxu1 }
 0x1c4   :  { %v209_v23 = vsel %vm208_vm3, %v205_v21, -inf }
 0x1c5   :  { %v210_v24 = vrot.slane %v209_v23, 4 }
 0x1c7   :  { %v211_v25 = vmax.f32 %v209_v23, %v210_v24 }
 0x1c9   :  { %v212_v26 = vrot.slane %v211_v25, 2 }
 0x1cb   :  { %v213_v28 = vmax.f32 %v211_v25, %v212_v26 }
 0x1cd   :  { %v214_v29 = vrot.slane %v213_v28, 1 }
 0x1cf   :  { %v215_v31 = vmax.f32 %v213_v28, %v214_v29 }
 0x1d1   :  { %v216_v32 = vsub.f32 %v205_v21, %v215_v31  ;;  %vm242_vm4 = vcmp.eq.f32.partialorder %v205_v21, %v215_v31 }
 0x1d2   :  { %v243_v33 = vsel %vm242_vm4, %v241_v30, 6 }
 0x1d3   :  { %v217_v34 = vmul.f32 1.442695, %v216_v32  ;;  %v244_v35 = vsel %vm208_vm3, %v243_v33, 2147483647 }
 0x1d4   :  { %v245_v36 = vrot.slane %v244_v35, 4 }
 0x1d5   :  { %337 = vpow2.f32 %v217_v34 }
 0x1d6   :  { %vm246_vm5 = vcmp.lt.s32.totalorder %v244_v35, %v245_v36 }
 0x1d7   :  { %v247_v37 = vsel %vm246_vm5, %v244_v35, %v245_v36 }
 0x1d8   :  { %v248_v38 = vrot.slane %v247_v37, 2 }
 0x1da   :  { %vm249_vm6 = vcmp.lt.s32.totalorder %v247_v37, %v248_v38 }
 0x1db   :  { %v250_v39 = vsel %vm249_vm6, %v247_v37, %v248_v38 }
 0x1dc   :  { %v251_v40 = vrot.slane %v250_v39, 1 }
 0x1de   :  { %vm252_vm8 = vcmp.lt.s32.totalorder %v250_v39, %v251_v40 }
 0x1df   :  { %v338_v41 = vpop.eup %337  ;;  %v253_v42 = vsel %vm252_vm8, %v250_v39, %v251_v40 }
 0x1e0   :  { %v219_v43 = vsel %vm208_vm3, %v338_v41, 0.0  ;;  %v229_v44 = vmul.f32 %v338_v41, %v216_v32  ;;  %255 = vst.msk [vmem:[#allocation2] sm:$0x1] %vm254_vm7, %v253_v42 }
 0x1e1   :  { %v220_v45 = vrot.slane %v219_v43, 4 }
 0x1e2   :  { %354 = shalt.err (!%p351_p4)
}
 0x1e3   :  { %s355_s16 = scalar_lea.hbm %s537_s5, 16 }
 0x1e4   :  { %p356_p5 = scmp.ne.s32.totalorder %s537_s5, %s355_s16  ;;  %p359_p6 = scmp.lt.u32.totalorder %s355_s16, %s537_s5 }
 0x1e6   :  { %p361_p7 = pnand %p359_p6, %p356_p5 }
 0x1e8   :  { %364 = shalt.err (!%p361_p7)
}
 0x1e9   :  { %267 = dma.vmem_to_hbm [thread:$0]  %s265_s4, 16, %s537_s5, [#allocation3]   ;;  %v230_v46 = vsel %vm208_vm3, %v229_v44, 0.0  ;;  %v221_v47 = vadd.f32 %v220_v45, %v219_v43 }
 0x1ea   :  { %v231_v48 = vrot.slane %v230_v46, 4  ;;  %s418_s23 = smov [#allocation4]   ;;  %s419_s5 = smov [#allocation6]  }
 0x1eb   :  { %v222_v49 = vrot.slane %v221_v47, 2  ;;  %s274_s24 = sshll.u32 %s418_s23, 4  ;;  %s284_s25 = sshll.u32 %s419_s5, 4  ;;  %s275_s24 = int_to_ptr.vmem [resolvable:$true] %s274_s24  ;;  %s498_s25 = int_to_ptr.vmem [resolvable:$true] %s284_s25 }
 0x1ec   :  { %v232_v50 = vadd.f32 %v231_v48, %v230_v46  ;;  %s365_s26 = scalar_lea.vmem %s275_s24, 16  ;;  %s369_s27 = scalar_lea.vmem %s275_s24, 32 }
 0x1ed   :  { %v223_v51 = vadd.f32 %v222_v49, %v221_v47  ;;  %p366_p8 = scmp.ne.s32.totalorder %s275_s24, %s365_s26  ;;  %p370_p9 = scmp.lt.s32.totalorder %s275_s24, %s275_s24 }
 0x1ee   :  { %v233_v54 = vrot.slane %v232_v50, 2  ;;  %p371_p10 = scmp.lt.s32.totalorder %s369_s27, %s365_s26 }
 0x1ef   :  { %v224_v52 = vrot.slane %v223_v51, 1 }
 0x1f0   :  { %v234_v55 = vadd.f32 %v233_v54, %v232_v50  ;;  %p372_p11 = por %p371_p10, %p370_p9 }
 0x1f1   :  { %v225_v53 = vadd.f32 %v224_v52, %v223_v51 }
 0x1f2   :  { %v235_v56 = vrot.slane %v234_v55, 1  ;;  %p373_p12 = pnand %p372_p11, %p366_p8 }
 0x1f3   :  { %339 = vlog2.f32 %v225_v53 }
 0x1f4   :  { %341 = vrcp.f32 %v225_v53  ;;  %v236_v58 = vadd.f32 %v235_v56, %v234_v55 }
 0x1fd   :  { %v340_v57 = vpop.eup %339 }
 0x1fe   :  { %v342_v59 = vpop.eup %341  ;;  %v227_v60 = vmul.f32 0.6931472, %v340_v57 }
 0x1ff   :  { %v238_v61 = vmul.f32 %v342_v59, %v236_v58 }
 0x200   :  { %v228_v62 = vsub.f32 0.0, %v227_v60 }
 0x201   :  { %v239_v63 = vsub.f32 %v227_v60, %v238_v61 }
 0x202   :  { %256 = vst.msk [vmem:[#allocation4] sm:$0x1] %vm254_vm7, %v228_v62 }
 0x203   :  { %376 = shalt.err (!%p373_p12)
}
 0x204   :  { %s377_s30 = scalar_lea.hbm %s538_s6, 16 }
 0x205   :  { %p378_p13 = scmp.ne.s32.totalorder %s538_s6, %s377_s30  ;;  %p381_p0 = scmp.lt.u32.totalorder %s377_s30, %s538_s6 }
 0x207   :  { %p383_p1 = pnand %p381_p0, %p378_p13 }
 0x209   :  { %386 = shalt.err (!%p383_p1)
}
 0x20a   :  { %277 = dma.vmem_to_hbm [thread:$0]  %s275_s24, 16, %s538_s6, [#allocation5]   ;;  %257 = vst.msk [vmem:[#allocation6] sm:$0x1] %vm254_vm7, %v239_v63 }
 0x20b   :  { %s387_s2 = scalar_lea.vmem %s498_s25, 16  ;;  %s391_s3 = scalar_lea.vmem %s498_s25, 32 }
 0x20c   :  { %p388_p2 = scmp.ne.s32.totalorder %s498_s25, %s387_s2  ;;  %p392_p3 = scmp.lt.s32.totalorder %s498_s25, %s498_s25 }
 0x20d   :  { %p393_p4 = scmp.lt.s32.totalorder %s391_s3, %s387_s2 }
 0x20f   :  { %p394_p5 = por %p393_p4, %p392_p3 }
 0x211   :  { %p395_p6 = pnand %p394_p5, %p388_p2 }
 0x213   :  { %398 = shalt.err (!%p395_p6)
}
 0x214   :  { %s399_s13 = scalar_lea.hbm %s539_s7, 16 }
 0x215   :  { %p400_p7 = scmp.ne.s32.totalorder %s539_s7, %s399_s13  ;;  %p403_p8 = scmp.lt.u32.totalorder %s399_s13, %s539_s7 }
 0x217   :  { %p405_p9 = pnand %p403_p8, %p400_p7 }
 0x219   :  { %408 = shalt.err (!%p405_p9)
}
 0x21a   :  { %287 = dma.vmem_to_hbm [thread:$0]  %s498_s25, 16, %s539_s7, [#allocation5]  }
 0x21b   :  { %409 = dma.done.wait [#allocation3], 16  }
 0x21c   :  { %410 = vsyncadd [#allocation3], 4294967280 }
 0x21d   :  { %411 = dma.done.wait [#allocation5], 32  }
 0x21e   :  { %412 = vsyncadd [#allocation5], 4294967264 }
 0x21f   :  { %297 = vsyncpa [#allocation3], 1 }
 0x220   :  { %298 = vsyncpa [#allocation5], 1 }

</bundles_post_ra>
